<compile_context>
chip_gen: v5e
topology: v5e:2x2
jax: 0.10.0
libtpu: 0.0.40
codegen_flags: <defaults>
</compile_context>

<pallas_src>
import jax
import jax.numpy as jnp
from jax.experimental import pallas as pl
from jax.experimental.pallas import tpu as pltpu


def _round_up(x: int, m: int) -> int:
    return ((x + m - 1) // m) * m


# ----------------------------------------------------------------------------
# Fused sincos: shared Cody-Waite range reduction (z = r + k*pi/2, |r|<=pi/4)
# followed by the cephes sinf/cosf minimax polynomials.  One reduction and one
# quadrant select feed both outputs (pure VPU work, no EUP/libm call).
_TWO_OVER_PI = 0.6366197723675814
_PIO2_1 = 1.5703125                   # pi/2 split into pieces with few
_PIO2_2 = 4.837512969970703125e-4     # significand bits so k * piece is exact
_PIO2_3 = 7.54978995489188216e-8      # in f32 for the |k| range seen here


def _sincos(z):
    k = jnp.floor(z * _TWO_OVER_PI + 0.5)          # round-to-nearest
    kq = k.astype(jnp.int32)
    r = z - k * _PIO2_1
    r = r - k * _PIO2_2
    r = r - k * _PIO2_3
    r2 = r * r
    sin_r = r + r * r2 * (-1.6666654611e-1
                          + r2 * (8.3321608736e-3 + r2 * (-1.9515295891e-4)))
    cos_r = 1.0 - 0.5 * r2 + r2 * r2 * (4.166664568298827e-2
                                        + r2 * (-1.388731625493765e-3
                                                + r2 * 2.443315711809948e-5))
    swap = (kq & 1) == 1
    sin_sign = jnp.where((kq & 2) == 0, 1.0, -1.0)
    cos_sign = jnp.where(((kq + 1) & 2) == 0, 1.0, -1.0)
    sin_z = jnp.where(swap, cos_r, sin_r) * sin_sign
    cos_z = jnp.where(swap, sin_r, cos_r) * cos_sign
    return sin_z, cos_z


# ----------------------------------------------------------------------------
# Kernel bodies.
def _gaussian_kernel(scale: float, d: int, split_store: bool):
    def kernel(xy_ref, w_ref, o_ref):
        # One MXU matmul for the stacked [tm, F] x [F, d] tile, f32 accumulation.
        z = jnp.dot(xy_ref[...], w_ref[...], preferred_element_type=jnp.float32)
        s, c = _sincos(z)
        if split_store:
            # d is a multiple of 128: two 128-aligned, lane-dense slice stores.
            o_ref[:, :d] = (s * scale).astype(o_ref.dtype)
            o_ref[:, d:] = (c * scale).astype(o_ref.dtype)
        else:
            # Small d: single full-block store; avoids any padded columns and
            # any post-kernel concatenate/slice pass.
            o_ref[...] = (jnp.concatenate([s, c], axis=-1) * scale).astype(o_ref.dtype)
    return kernel


def _arccos_kernel(scale: float):
    def kernel(xy_ref, w_ref, o_ref):
        z = jnp.dot(xy_ref[...], w_ref[...], preferred_element_type=jnp.float32)
        o_ref[...] = (jnp.maximum(z, 0.0) * scale).astype(o_ref.dtype)
    return kernel


# ----------------------------------------------------------------------------
def rff_forward(x, y, w, kernel: str = "gaussian", *,
                matmul_dtype=jnp.bfloat16, out_dtype=jnp.float32,
                vmem_budget_bytes=32 * 1024 * 1024):
    """Pallas implementation of RFF.forward.

    x, y : [N, *] arrays (flattened to [N, feature_dim])
    w    : [feature_dim, D] random weights (D = rff_dim // 2 if gaussian)
    Returns (phi_x, phi_y): [N, 2*D] (gaussian) or [N, D] (arccos) in out_dtype.

    matmul_dtype : dtype the MXU operands are cast to (bf16 recommended;
                   accumulation is always f32).  Use f32 for exact parity with
                   the PyTorch module's f32 matmul.
    out_dtype    : dtype of the stored features (f32 matches PyTorch; bf16
                   halves the dominant output writeback stream).
    """
    assert kernel in ("gaussian", "arccos")

    # Cast BEFORE stacking/padding so the wrapper staging passes move half the
    # bytes and XLA can fuse pad + convert.
    x2 = x.reshape(x.shape[0], -1).astype(matmul_dtype)
    y2 = y.reshape(y.shape[0], -1).astype(matmul_dtype)
    n, f = x2.shape
    assert y2.shape[1] == f, "x/y feature_dim mismatch"
    fd, d = w.shape
    assert fd == f, f"feature_dim mismatch: {fd} vs {f}"

    scale = float(d) ** -0.5

    # One stacked operand -> one matmul covers both x and y.
    xy = jnp.concatenate([x2, y2], axis=0)
    m = xy.shape[0]

    # Contraction dim padded to 128 lanes (lane-dense loads).  No column
    # padding on W / the output: their blocks span the full last dim.
    f_pad = _round_up(f, 128)
    out_cols = 2 * d if kernel == "gaussian" else d

    # ---- Row tile from an explicit VMEM budget (double-buffered tiles). ----
    mm_size = jnp.dtype(matmul_dtype).itemsize
    out_size = jnp.dtype(out_dtype).itemsize
    w_bytes = 2 * f_pad * d * mm_size                         # pinned W, 2 bufs
    row_bytes = 2 * (f_pad * mm_size + out_cols * out_size)   # xy + out per row
    rows = _round_up(m, 8)
    tm = int(max(8, (vmem_budget_bytes - w_bytes) // max(row_bytes, 1)))
    tm = min(tm, 1024, rows)
    if tm >= 256:
        tm = (tm // 256) * 256          # v6e/v7x MXU passes are 256 tall
    else:
        tm = max(8, (tm // 8) * 8)
    # Keep >= 2 row tiles when there are enough rows so v7x's 2 TCs both work.
    if rows >= 512:
        tm = min(tm, _round_up(rows // 2, 256))
    m_pad = _round_up(m, tm)
    grid = (m_pad // tm,)

    # TODO(synk): for very large F*D on v7x (64 MiB VMEM) the pinned W tile
    # should be streamed over a column grid axis (needs split sin/cos outputs);
    # not required at these sizes.
    vmem_used = w_bytes + tm * row_bytes
    vmem_limit = int(max(48 * 1024 * 1024, vmem_used + (4 << 20)))

    xy_p = jnp.pad(xy, ((0, m_pad - m), (0, f_pad - f)))
    w_p = jnp.pad(w.astype(matmul_dtype), ((0, f_pad - f), (0, 0)))

    if kernel == "gaussian":
        body = _gaussian_kernel(scale, d, split_store=(d % 128 == 0))
        n_transcendentals = m_pad * d          # one fused sincos per element
    else:
        body = _arccos_kernel(scale)
        n_transcendentals = 0

    cost = pl.CostEstimate(
        flops=2 * m_pad * f_pad * d,
        transcendentals=n_transcendentals,
        bytes_accessed=(m_pad * f_pad + f_pad * d) * mm_size
        + m_pad * out_cols * out_size,
    )

    out = pl.pallas_call(
        body,
        out_shape=jax.ShapeDtypeStruct((m_pad, out_cols), out_dtype),
        grid=grid,
        in_specs=[
            pl.BlockSpec((tm, f_pad), lambda i: (i, 0)),   # stacked x/y rows
            pl.BlockSpec((f_pad, d), lambda i: (0, 0)),    # weights, pinned
        ],
        out_specs=pl.BlockSpec((tm, out_cols), lambda i: (i, 0)),
        compiler_params=pltpu.CompilerParams(
            dimension_semantics=("parallel",),   # row tiles shard across TCs
            vmem_limit_bytes=vmem_limit,
        ),
        cost_estimate=cost,
    )(xy_p, w_p)

    # Strip row padding only (padded rows hold cos(0)*scale garbage) and split
    # the stacked result back into x and y.  No column epilogue needed.
    phi = out[:m]
    return phi[:n], phi[n:]


def rff_reference(x, y, w, kernel: str = "gaussian", *, matmul_dtype=jnp.float32):
    """Pure-JAX reference matching the PyTorch semantics (same matmul dtype)."""
    x2 = x.reshape(x.shape[0], -1)
    y2 = y.reshape(y.shape[0], -1)
    d = w.shape[1]
    scale = d ** (-0.5)
    wc = w.astype(matmul_dtype)
    zx = jnp.dot(x2.astype(matmul_dtype), wc, preferred_element_type=jnp.float32)
    zy = jnp.dot(y2.astype(matmul_dtype), wc, preferred_element_type=jnp.float32)
    if kernel == "gaussian":
        fx = jnp.concatenate([jnp.sin(zx), jnp.cos(zx)], axis=-1) * scale
        fy = jnp.concatenate([jnp.sin(zy), jnp.cos(zy)], axis=-1) * scale
    else:
        fx = jnp.maximum(zx, 0.0) * scale
        fy = jnp.maximum(zy, 0.0) * scale
    return fx, fy


if __name__ == "__main__":
    # Module config: feature_dim inferred from flattened input, rff_dim even
    # for the 'gaussian' kernel (internally halved).
    batch = 2
    c, h, wd = 4, 16, 16          # x: [2, 4, 16, 16] -> flatten(1) -> [2, 1024]
    feature_dim = c * h * wd      # 1024
    rff_dim = 64                  # gaussian -> w has rff_dim // 2 = 32 columns

    key = jax.random.PRNGKey(0)
    kx, ky, kw = jax.random.split(key, 3)
    x = jax.random.normal(kx, (batch, c, h, wd), dtype=jnp.float32)
    y = jax.random.normal(ky, (batch, c, h, wd), dtype=jnp.float32)
    # TODO(synk): PyTorch draws torch.randn weights fresh inside every forward;
    # here the (same-distribution) weights are drawn once host-side and passed in.
    w = jax.random.normal(kw, (feature_dim, rff_dim // 2), dtype=jnp.float32)

    for kern in ("gaussian", "arccos"):
        out_dim = rff_dim if kern == "gaussian" else rff_dim // 2
        cases = (
            (jnp.float32, jnp.float32, 1e-4),    # numerics-parity path
            (jnp.bfloat16, jnp.float32, 5e-3),   # bf16 MXU, f32 features
            (jnp.bfloat16, jnp.bfloat16, 2e-2),  # bf16 MXU + bf16 features
        )
        for mm_dtype, o_dtype, tol in cases:
            phi_x, phi_y = rff_forward(x, y, w, kernel=kern,
                                       matmul_dtype=mm_dtype, out_dtype=o_dtype)
            jax.block_until_ready((phi_x, phi_y))
            ref_x, ref_y = rff_reference(x, y, w, kernel=kern, matmul_dtype=mm_dtype)
            assert phi_x.shape == (batch, out_dim), phi_x.shape
            assert phi_y.shape == (batch, out_dim), phi_y.shape
            assert jnp.allclose(phi_x.astype(jnp.float32), ref_x,
                                atol=tol, rtol=tol), (kern, mm_dtype, o_dtype)
            assert jnp.allclose(phi_y.astype(jnp.float32), ref_y,
                                atol=tol, rtol=tol), (kern, mm_dtype, o_dtype)

    print("KERNEL_OK")
</pallas_src>

<mosaic_0001>
module attributes {stable_mosaic.version = 11 : i64} {
  func.func @kernel(%arg0: i32, %arg1: memref<8x1024xf32, #tpu.memory_space<vmem>>, %arg2: memref<1024x32xf32, #tpu.memory_space<vmem>>, %arg3: memref<8x64xf32, #tpu.memory_space<vmem>>) attributes {dimension_semantics = [#tpu.dimension_semantics<parallel>], iteration_bounds = array<i64: 1>, scalar_prefetch = 0 : i64, scratch_operands = 0 : i64, tpu.core_type = #tpu.core_type<tc>, window_params = [{transform_indices = @transform_0, window_bounds = array<i64: 8, 1024>}, {pipeline_mode = #tpu.pipeline_mode<synchronous>, transform_indices = @transform_1, window_bounds = array<i64: 1024, 32>}, {transform_indices = @transform_2, window_bounds = array<i64: 8, 64>}]} {
    %c0 = arith.constant 0 : index
    %c0_0 = arith.constant 0 : index
    %0 = vector.load %arg1[%c0, %c0_0] : memref<8x1024xf32, #tpu.memory_space<vmem>>, vector<8x1024xf32>
    %c0_1 = arith.constant 0 : index
    %c0_2 = arith.constant 0 : index
    %1 = vector.load %arg2[%c0_1, %c0_2] : memref<1024x32xf32, #tpu.memory_space<vmem>>, vector<1024x32xf32>
    %cst = arith.constant dense<0.000000e+00> : vector<8x32xf32>
    %2 = tpu.matmul %0, %1, %cst {dimension_numbers = #tpu.dot_dimension_numbers<[1], [0], [0], [1], [0, 0, 1, 1], [], []>} : vector<8x1024xf32>, vector<1024x32xf32>, vector<8x32xf32> -> vector<8x32xf32>
    %cst_3 = arith.constant 0.636619746 : f32
    %3 = vector.broadcast %cst_3 : f32 to vector<8x32xf32>
    %4 = arith.mulf %2, %3 : vector<8x32xf32>
    %cst_4 = arith.constant 5.000000e-01 : f32
    %5 = vector.broadcast %cst_4 : f32 to vector<8x32xf32>
    %6 = arith.addf %4, %5 : vector<8x32xf32>
    %7 = math.floor %6 : vector<8x32xf32>
    %8 = arith.fptosi %7 : vector<8x32xf32> to vector<8x32xi32>
    %cst_5 = arith.constant 1.5703125 : f32
    %9 = vector.broadcast %cst_5 : f32 to vector<8x32xf32>
    %10 = arith.mulf %7, %9 : vector<8x32xf32>
    %11 = arith.subf %2, %10 : vector<8x32xf32>
    %cst_6 = arith.constant 4.83751297E-4 : f32
    %12 = vector.broadcast %cst_6 : f32 to vector<8x32xf32>
    %13 = arith.mulf %7, %12 : vector<8x32xf32>
    %14 = arith.subf %11, %13 : vector<8x32xf32>
    %cst_7 = arith.constant 7.549790e-08 : f32
    %15 = vector.broadcast %cst_7 : f32 to vector<8x32xf32>
    %16 = arith.mulf %7, %15 : vector<8x32xf32>
    %17 = arith.subf %14, %16 : vector<8x32xf32>
    %18 = arith.mulf %17, %17 : vector<8x32xf32>
    %19 = arith.mulf %17, %18 : vector<8x32xf32>
    %cst_8 = arith.constant -1.95152956E-4 : f32
    %20 = vector.broadcast %cst_8 : f32 to vector<8x32xf32>
    %21 = arith.mulf %18, %20 : vector<8x32xf32>
    %cst_9 = arith.constant 0.00833216123 : f32
    %22 = vector.broadcast %cst_9 : f32 to vector<8x32xf32>
    %23 = arith.addf %22, %21 : vector<8x32xf32>
    %24 = arith.mulf %18, %23 : vector<8x32xf32>
    %cst_10 = arith.constant -0.166666552 : f32
    %25 = vector.broadcast %cst_10 : f32 to vector<8x32xf32>
    %26 = arith.addf %25, %24 : vector<8x32xf32>
    %27 = arith.mulf %19, %26 : vector<8x32xf32>
    %28 = arith.addf %17, %27 : vector<8x32xf32>
    %cst_11 = arith.constant 5.000000e-01 : f32
    %29 = vector.broadcast %cst_11 : f32 to vector<8x32xf32>
    %30 = arith.mulf %29, %18 : vector<8x32xf32>
    %cst_12 = arith.constant 1.000000e+00 : f32
    %31 = vector.broadcast %cst_12 : f32 to vector<8x32xf32>
    %32 = arith.subf %31, %30 : vector<8x32xf32>
    %33 = arith.mulf %18, %18 : vector<8x32xf32>
    %cst_13 = arith.constant 2.44331568E-5 : f32
    %34 = vector.broadcast %cst_13 : f32 to vector<8x32xf32>
    %35 = arith.mulf %18, %34 : vector<8x32xf32>
    %cst_14 = arith.constant -0.00138873165 : f32
    %36 = vector.broadcast %cst_14 : f32 to vector<8x32xf32>
    %37 = arith.addf %36, %35 : vector<8x32xf32>
    %38 = arith.mulf %18, %37 : vector<8x32xf32>
    %cst_15 = arith.constant 0.0416666456 : f32
    %39 = vector.broadcast %cst_15 : f32 to vector<8x32xf32>
    %40 = arith.addf %39, %38 : vector<8x32xf32>
    %41 = arith.mulf %33, %40 : vector<8x32xf32>
    %42 = arith.addf %32, %41 : vector<8x32xf32>
    %c1_i32 = arith.constant 1 : i32
    %43 = vector.broadcast %c1_i32 : i32 to vector<8x32xi32>
    %44 = arith.andi %8, %43 : vector<8x32xi32>
    %c1_i32_16 = arith.constant 1 : i32
    %45 = vector.broadcast %c1_i32_16 : i32 to vector<8x32xi32>
    %46 = arith.cmpi eq, %44, %45 : vector<8x32xi32>
    %c2_i32 = arith.constant 2 : i32
    %47 = vector.broadcast %c2_i32 : i32 to vector<8x32xi32>
    %48 = arith.andi %8, %47 : vector<8x32xi32>
    %c0_i32 = arith.constant 0 : i32
    %49 = vector.broadcast %c0_i32 : i32 to vector<8x32xi32>
    %50 = arith.cmpi eq, %48, %49 : vector<8x32xi32>
    %cst_17 = arith.constant 1.000000e+00 : f32
    %cst_18 = arith.constant -1.000000e+00 : f32
    %51 = vector.broadcast %cst_17 : f32 to vector<8x32xf32>
    %52 = vector.broadcast %cst_18 : f32 to vector<8x32xf32>
    %53 = arith.select %50, %51, %52 : vector<8x32xi1>, vector<8x32xf32>
    %c1_i32_19 = arith.constant 1 : i32
    %54 = vector.broadcast %c1_i32_19 : i32 to vector<8x32xi32>
    %55 = arith.addi %8, %54 : vector<8x32xi32>
    %c2_i32_20 = arith.constant 2 : i32
    %56 = vector.broadcast %c2_i32_20 : i32 to vector<8x32xi32>
    %57 = arith.andi %55, %56 : vector<8x32xi32>
    %c0_i32_21 = arith.constant 0 : i32
    %58 = vector.broadcast %c0_i32_21 : i32 to vector<8x32xi32>
    %59 = arith.cmpi eq, %57, %58 : vector<8x32xi32>
    %cst_22 = arith.constant 1.000000e+00 : f32
    %cst_23 = arith.constant -1.000000e+00 : f32
    %60 = vector.broadcast %cst_22 : f32 to vector<8x32xf32>
    %61 = vector.broadcast %cst_23 : f32 to vector<8x32xf32>
    %62 = arith.select %59, %60, %61 : vector<8x32xi1>, vector<8x32xf32>
    %63 = arith.select %46, %42, %28 : vector<8x32xi1>, vector<8x32xf32>
    %64 = arith.mulf %63, %53 : vector<8x32xf32>
    %65 = arith.select %46, %28, %42 : vector<8x32xi1>, vector<8x32xf32>
    %66 = arith.mulf %65, %62 : vector<8x32xf32>
    %67 = tpu.concatenate %64, %66 in 1 : vector<8x32xf32>, vector<8x32xf32> -> vector<8x64xf32>
    %cst_24 = arith.constant 0.176776692 : f32
    %68 = vector.broadcast %cst_24 : f32 to vector<8x64xf32>
    %69 = arith.mulf %67, %68 : vector<8x64xf32>
    %c0_25 = arith.constant 0 : index
    %c0_26 = arith.constant 0 : index
    %70 = vector.load %arg3[%c0_25, %c0_26] : memref<8x64xf32, #tpu.memory_space<vmem>>, vector<8x64xf32>
    tpu.vector_store %arg3[%c0_25, %c0_26], %69 {strides = array<i32>} : memref<8x64xf32, #tpu.memory_space<vmem>>, vector<8x64xf32>,
    return
  }
  func.func @transform_0(%arg0: i32) -> (i32, i32) {
    %c0_i32 = arith.constant 0 : i32
    %c0_i32_0 = arith.constant 0 : i32
    return %arg0, %c0_i32 : i32, i32
  }
  func.func @transform_1(%arg0: i32) -> (i32, i32) {
    %c0_i32 = arith.constant 0 : i32
    %c0_i32_0 = arith.constant 0 : i32
    %c0_i32_1 = arith.constant 0 : i32
    return %c0_i32, %c0_i32_0 : i32, i32
  }
  func.func @transform_2(%arg0: i32) -> (i32, i32) {
    %c0_i32 = arith.constant 0 : i32
    %c0_i32_0 = arith.constant 0 : i32
    return %arg0, %c0_i32 : i32, i32
  }
}

</mosaic_0001>

<bundles_post_ra>
// kernel: tpu_custom_call.1
= control target key start
LH: loop header
LB: loop body
LE: loop exit
PB: predicated region body
PF: predicated region fallthrough
CT: control target
= control target key end

     0   :  { %s833_s0 = inlined_call_operand.vmem [shape: f32[8,1024], index: 0, kind: input, shape index: {}]   ;;  %s834_s1 = inlined_call_operand.vmem [shape: f32[1024,32], index: 1, kind: input, shape index: {}]   ;;  %s835_s2 = inlined_call_operand.hbm [shape: f32[8,64], index: 2, kind: output, shape index: {}]  }
   0x1   :  { %v35_v0 = vld [vmem:[%s834_s1 + $0x78] sm:$0xff]  ;;  %v34_v2 = vld [vmem:[%s834_s1 + $0x70] sm:$0xff]  ;;  %v33_v6 = vld [vmem:[%s834_s1 + $0x68] sm:$0xff] }
   0x2   :  { %v67_v1 = vld [vmem:[%s834_s1 + $0x178] sm:$0xff]  ;;  %148 = vmatpush.msra.mxu0 %v35_v0  ;;  %v66_v4 = vld [vmem:[%s834_s1 + $0x170] sm:$0xff]  ;;  %v65_v8 = vld [vmem:[%s834_s1 + $0x168] sm:$0xff] }
   0x3   :  { %188 = vmatpush.msra.mxu2 %v67_v1  ;;  %v51_v3 = vld [vmem:[%s834_s1 + $0xf8] sm:$0xff]  ;;  %v50_v7 = vld [vmem:[%s834_s1 + $0xf0] sm:$0xff]  ;;  %v49_v10 = vld [vmem:[%s834_s1 + $0xe8] sm:$0xff] }
   0x4   :  { %v83_v5 = vld [vmem:[%s834_s1 + $0x1f8] sm:$0xff]  ;;  %168 = vmatpush.msra.mxu1 %v51_v3  ;;  %149 = vmatpush.msra.mxu0 %v34_v2  ;;  %v82_v9 = vld [vmem:[%s834_s1 + $0x1f0] sm:$0xff]  ;;  %v32_v11 = vld [vmem:[%s834_s1 + $0x60] sm:$0xff] }
   0x5   :  { %208 = vmatpush.msra.mxu3 %v83_v5  ;;  %189 = vmatpush.msra.mxu2 %v66_v4  ;;  %v64_v12 = vld [vmem:[%s834_s1 + $0x160] sm:$0xff]  ;;  %v81_v13 = vld [vmem:[%s834_s1 + $0x1e8] sm:$0xff]  ;;  %v31_v16 = vld [vmem:[%s834_s1 + $0x58] sm:$0xff] }
   0x6   :  { %169 = vmatpush.msra.mxu1 %v50_v7  ;;  %150 = vmatpush.msra.mxu0 %v33_v6  ;;  %v48_v14 = vld [vmem:[%s834_s1 + $0xe0] sm:$0xff]  ;;  %v63_v17 = vld [vmem:[%s834_s1 + $0x158] sm:$0xff]  ;;  %v30_v20 = vld [vmem:[%s834_s1 + $0x50] sm:$0xff] }
   0x7   :  { %209 = vmatpush.msra.mxu3 %v82_v9  ;;  %190 = vmatpush.msra.mxu2 %v65_v8  ;;  %v80_v15 = vld [vmem:[%s834_s1 + $0x1e0] sm:$0xff]  ;;  %v47_v18 = vld [vmem:[%s834_s1 + $0xd8] sm:$0xff]  ;;  %v62_v21 = vld [vmem:[%s834_s1 + $0x150] sm:$0xff] }
   0x8   :  { %170 = vmatpush.msra.mxu1 %v49_v10  ;;  %151 = vmatpush.msra.mxu0 %v32_v11  ;;  %v79_v19 = vld [vmem:[%s834_s1 + $0x1d8] sm:$0xff]  ;;  %v46_v22 = vld [vmem:[%s834_s1 + $0xd0] sm:$0xff]  ;;  %v29_v24 = vld [vmem:[%s834_s1 + $0x48] sm:$0xff] }
   0x9   :  { %210 = vmatpush.msra.mxu3 %v81_v13  ;;  %191 = vmatpush.msra.mxu2 %v64_v12  ;;  %v78_v23 = vld [vmem:[%s834_s1 + $0x1d0] sm:$0xff]  ;;  %v61_v25 = vld [vmem:[%s834_s1 + $0x148] sm:$0xff]  ;;  %v28_v28 = vld [vmem:[%s834_s1 + $0x40] sm:$0xff] }
   0xa   :  { %171 = vmatpush.msra.mxu1 %v48_v14  ;;  %152 = vmatpush.msra.mxu0 %v31_v16  ;;  %v45_v26 = vld [vmem:[%s834_s1 + $0xc8] sm:$0xff]  ;;  %v60_v29 = vld [vmem:[%s834_s1 + $0x140] sm:$0xff]  ;;  %v27_v32 = vld [vmem:[%s834_s1 + $0x38] sm:$0xff] }
   0xb   :  { %211 = vmatpush.msra.mxu3 %v80_v15  ;;  %192 = vmatpush.msra.mxu2 %v63_v17  ;;  %v77_v27 = vld [vmem:[%s834_s1 + $0x1c8] sm:$0xff]  ;;  %v44_v30 = vld [vmem:[%s834_s1 + $0xc0] sm:$0xff]  ;;  %v59_v33 = vld [vmem:[%s834_s1 + $0x138] sm:$0xff] }
   0xc   :  { %172 = vmatpush.msra.mxu1 %v47_v18  ;;  %153 = vmatpush.msra.mxu0 %v30_v20  ;;  %v76_v31 = vld [vmem:[%s834_s1 + $0x1c0] sm:$0xff]  ;;  %v43_v34 = vld [vmem:[%s834_s1 + $0xb8] sm:$0xff]  ;;  %v26_v36 = vld [vmem:[%s834_s1 + $0x30] sm:$0xff] }
   0xd   :  { %212 = vmatpush.msra.mxu3 %v79_v19  ;;  %193 = vmatpush.msra.mxu2 %v62_v21  ;;  %v75_v35 = vld [vmem:[%s834_s1 + $0x1b8] sm:$0xff]  ;;  %v58_v37 = vld [vmem:[%s834_s1 + $0x130] sm:$0xff]  ;;  %v25_v40 = vld [vmem:[%s834_s1 + $0x28] sm:$0xff] }
   0xe   :  { %173 = vmatpush.msra.mxu1 %v46_v22  ;;  %154 = vmatpush.msra.mxu0 %v29_v24  ;;  %v42_v38 = vld [vmem:[%s834_s1 + $0xb0] sm:$0xff]  ;;  %v57_v41 = vld [vmem:[%s834_s1 + $0x128] sm:$0xff]  ;;  %v24_v44 = vld [vmem:[%s834_s1 + $0x20] sm:$0xff] }
   0xf   :  { %213 = vmatpush.msra.mxu3 %v78_v23  ;;  %194 = vmatpush.msra.mxu2 %v61_v25  ;;  %v74_v39 = vld [vmem:[%s834_s1 + $0x1b0] sm:$0xff]  ;;  %v41_v42 = vld [vmem:[%s834_s1 + $0xa8] sm:$0xff]  ;;  %v56_v45 = vld [vmem:[%s834_s1 + $0x120] sm:$0xff] }
  0x10   :  { %174 = vmatpush.msra.mxu1 %v45_v26  ;;  %155 = vmatpush.msra.mxu0 %v28_v28  ;;  %v73_v43 = vld [vmem:[%s834_s1 + $0x1a8] sm:$0xff]  ;;  %v40_v46 = vld [vmem:[%s834_s1 + $0xa0] sm:$0xff]  ;;  %v23_v48 = vld [vmem:[%s834_s1 + $0x18] sm:$0xff] }
  0x11   :  { %214 = vmatpush.msra.mxu3 %v77_v27  ;;  %195 = vmatpush.msra.mxu2 %v60_v29  ;;  %v72_v47 = vld [vmem:[%s834_s1 + $0x1a0] sm:$0xff]  ;;  %v55_v49 = vld [vmem:[%s834_s1 + $0x118] sm:$0xff]  ;;  %v22_v52 = vld [vmem:[%s834_s1 + $0x10] sm:$0xff] }
  0x12   :  { %175 = vmatpush.msra.mxu1 %v44_v30  ;;  %156 = vmatpush.msra.mxu0 %v27_v32  ;;  %v39_v50 = vld [vmem:[%s834_s1 + $0x98] sm:$0xff]  ;;  %v54_v53 = vld [vmem:[%s834_s1 + $0x110] sm:$0xff]  ;;  %v21_v56 = vld [vmem:[%s834_s1 + $0x8] sm:$0xff] }
  0x13   :  { %215 = vmatpush.msra.mxu3 %v76_v31  ;;  %196 = vmatpush.msra.mxu2 %v59_v33  ;;  %v71_v51 = vld [vmem:[%s834_s1 + $0x198] sm:$0xff]  ;;  %v38_v54 = vld [vmem:[%s834_s1 + $0x90] sm:$0xff]  ;;  %v53_v57 = vld [vmem:[%s834_s1 + $0x108] sm:$0xff] }
  0x14   :  { %176 = vmatpush.msra.mxu1 %v43_v34  ;;  %157 = vmatpush.msra.mxu0 %v26_v36  ;;  %v70_v55 = vld [vmem:[%s834_s1 + $0x190] sm:$0xff]  ;;  %v37_v58 = vld [vmem:[%s834_s1 + $0x88] sm:$0xff]  ;;  %v20_v60 = vld [vmem:[%s834_s1] sm:$0xff] }
  0x15   :  { %216 = vmatpush.msra.mxu3 %v75_v35  ;;  %197 = vmatpush.msra.mxu2 %v58_v37  ;;  %v69_v59 = vld [vmem:[%s834_s1 + $0x188] sm:$0xff]  ;;  %v52_v61 = vld [vmem:[%s834_s1 + $0x100] sm:$0xff]  ;;  %v99_v62 = vld [vmem:[%s834_s1 + $0x278] sm:$0xff] }
  0x16   :  { %177 = vmatpush.msra.mxu1 %v42_v38  ;;  %158 = vmatpush.msra.mxu0 %v25_v40  ;;  %v131_v63 = vld [vmem:[%s834_s1 + $0x378] sm:$0xff]  ;;  %v36_v0 = vld [vmem:[%s834_s1 + $0x80] sm:$0xff]  ;;  %v98_v2 = vld [vmem:[%s834_s1 + $0x270] sm:$0xff] }
  0x17   :  { %217 = vmatpush.msra.mxu3 %v74_v39  ;;  %198 = vmatpush.msra.mxu2 %v57_v41  ;;  %v68_v1 = vld [vmem:[%s834_s1 + $0x180] sm:$0xff]  ;;  %v115_v3 = vld [vmem:[%s834_s1 + $0x2f8] sm:$0xff]  ;;  %v130_v4 = vld [vmem:[%s834_s1 + $0x370] sm:$0xff] }
  0x18   :  { %178 = vmatpush.msra.mxu1 %v41_v42  ;;  %159 = vmatpush.msra.mxu0 %v24_v44  ;;  %v147_v5 = vld [vmem:[%s834_s1 + $0x3f8] sm:$0xff]  ;;  %v97_v6 = vld [vmem:[%s834_s1 + $0x268] sm:$0xff]  ;;  %v114_v7 = vld [vmem:[%s834_s1 + $0x2f0] sm:$0xff] }
  0x19   :  { %218 = vmatpush.msra.mxu3 %v73_v43  ;;  %199 = vmatpush.msra.mxu2 %v56_v45  ;;  %v129_v8 = vld [vmem:[%s834_s1 + $0x368] sm:$0xff]  ;;  %v146_v9 = vld [vmem:[%s834_s1 + $0x3f0] sm:$0xff]  ;;  %v96_v10 = vld [vmem:[%s834_s1 + $0x260] sm:$0xff] }
  0x1a   :  { %179 = vmatpush.msra.mxu1 %v40_v46  ;;  %160 = vmatpush.msra.mxu0 %v23_v48  ;;  %v113_v11 = vld [vmem:[%s834_s1 + $0x2e8] sm:$0xff]  ;;  %v128_v12 = vld [vmem:[%s834_s1 + $0x360] sm:$0xff]  ;;  %v95_v14 = vld [vmem:[%s834_s1 + $0x258] sm:$0xff] }
  0x1b   :  { %219 = vmatpush.msra.mxu3 %v72_v47  ;;  %200 = vmatpush.msra.mxu2 %v55_v49  ;;  %v145_v13 = vld [vmem:[%s834_s1 + $0x3e8] sm:$0xff]  ;;  %v112_v15 = vld [vmem:[%s834_s1 + $0x2e0] sm:$0xff]  ;;  %v127_v16 = vld [vmem:[%s834_s1 + $0x358] sm:$0xff] }
  0x1c   :  { %180 = vmatpush.msra.mxu1 %v39_v50  ;;  %161 = vmatpush.msra.mxu0 %v22_v52  ;;  %v144_v17 = vld [vmem:[%s834_s1 + $0x3e0] sm:$0xff]  ;;  %v94_v18 = vld [vmem:[%s834_s1 + $0x250] sm:$0xff]  ;;  %v111_v19 = vld [vmem:[%s834_s1 + $0x2d8] sm:$0xff] }
  0x1d   :  { %220 = vmatpush.msra.mxu3 %v71_v51  ;;  %201 = vmatpush.msra.mxu2 %v54_v53  ;;  %v126_v20 = vld [vmem:[%s834_s1 + $0x350] sm:$0xff]  ;;  %v143_v21 = vld [vmem:[%s834_s1 + $0x3d8] sm:$0xff]  ;;  %v93_v22 = vld [vmem:[%s834_s1 + $0x248] sm:$0xff] }
  0x1e   :  { %181 = vmatpush.msra.mxu1 %v38_v54  ;;  %162 = vmatpush.msra.mxu0 %v21_v56  ;;  %v110_v23 = vld [vmem:[%s834_s1 + $0x2d0] sm:$0xff]  ;;  %v125_v24 = vld [vmem:[%s834_s1 + $0x348] sm:$0xff]  ;;  %v92_v26 = vld [vmem:[%s834_s1 + $0x240] sm:$0xff] }
  0x1f   :  { %221 = vmatpush.msra.mxu3 %v70_v55  ;;  %202 = vmatpush.msra.mxu2 %v53_v57  ;;  %v142_v25 = vld [vmem:[%s834_s1 + $0x3d0] sm:$0xff]  ;;  %v109_v27 = vld [vmem:[%s834_s1 + $0x2c8] sm:$0xff]  ;;  %v124_v28 = vld [vmem:[%s834_s1 + $0x340] sm:$0xff] }
  0x20   :  { %182 = vmatpush.msra.mxu1 %v37_v58  ;;  %163 = vmatpush.msra.mxu0 %v20_v60  ;;  %v141_v29 = vld [vmem:[%s834_s1 + $0x3c8] sm:$0xff]  ;;  %v91_v30 = vld [vmem:[%s834_s1 + $0x238] sm:$0xff]  ;;  %v108_v31 = vld [vmem:[%s834_s1 + $0x2c0] sm:$0xff] }
  0x21   :  { %222 = vmatpush.msra.mxu3 %v69_v59  ;;  %203 = vmatpush.msra.mxu2 %v52_v61 }
  0x22   :  { %228 = vmatpush.msrb.mxu0 %v99_v62  ;;  %183 = vmatpush.msra.mxu1 %v36_v0 }
  0x23   :  { %268 = vmatpush.msrb.mxu2 %v131_v63  ;;  %223 = vmatpush.msra.mxu3 %v68_v1 }
  0x24   :  { %229 = vmatpush.msrb.mxu0 %v98_v2  ;;  %248 = vmatpush.msrb.mxu1 %v115_v3 }
  0x25   :  { %269 = vmatpush.msrb.mxu2 %v130_v4  ;;  %288 = vmatpush.msrb.mxu3 %v147_v5 }
  0x26   :  { %230 = vmatpush.msrb.mxu0 %v97_v6  ;;  %249 = vmatpush.msrb.mxu1 %v114_v7 }
  0x27   :  { %270 = vmatpush.msrb.mxu2 %v129_v8  ;;  %289 = vmatpush.msrb.mxu3 %v146_v9 }
  0x28   :  { %231 = vmatpush.msrb.mxu0 %v96_v10  ;;  %250 = vmatpush.msrb.mxu1 %v113_v11 }
  0x29   :  { %271 = vmatpush.msrb.mxu2 %v128_v12  ;;  %290 = vmatpush.msrb.mxu3 %v145_v13 }
  0x2a   :  { %232 = vmatpush.msrb.mxu0 %v95_v14  ;;  %251 = vmatpush.msrb.mxu1 %v112_v15 }
  0x2b   :  { %272 = vmatpush.msrb.mxu2 %v127_v16  ;;  %291 = vmatpush.msrb.mxu3 %v144_v17 }
  0x2c   :  { %233 = vmatpush.msrb.mxu0 %v94_v18  ;;  %252 = vmatpush.msrb.mxu1 %v111_v19 }
  0x2d   :  { %273 = vmatpush.msrb.mxu2 %v126_v20  ;;  %292 = vmatpush.msrb.mxu3 %v143_v21 }
  0x2e   :  { %234 = vmatpush.msrb.mxu0 %v93_v22  ;;  %253 = vmatpush.msrb.mxu1 %v110_v23 }
  0x2f   :  { %274 = vmatpush.msrb.mxu2 %v125_v24  ;;  %293 = vmatpush.msrb.mxu3 %v142_v25 }
  0x30   :  { %7 = vsyncpa [#allocation3], 0  ;;  %235 = vmatpush.msrb.mxu0 %v92_v26  ;;  %254 = vmatpush.msrb.mxu1 %v109_v27  ;;  %v123_v32 = vld [vmem:[%s834_s1 + $0x338] sm:$0xff]  ;;  %v140_v33 = vld [vmem:[%s834_s1 + $0x3c0] sm:$0xff]  ;;  %vm352_vm3 = vcmask 261120   ;;  %s364_s4 = sshll.u32 %s835_s2, 4  ;;  %s365_s4 = int_to_ptr.hbm [resolvable:$true] %s364_s4 }
  0x31   :  { %275 = vmatpush.msrb.mxu2 %v124_v28  ;;  %294 = vmatpush.msrb.mxu3 %v141_v29  ;;  %v90_v34 = vld [vmem:[%s834_s1 + $0x230] sm:$0xff]  ;;  %v107_v35 = vld [vmem:[%s834_s1 + $0x2b8] sm:$0xff]  ;;  %v89_v38 = vld [vmem:[%s834_s1 + $0x228] sm:$0xff]  ;;  %vm355_vm4 = vcmask 523264  }
  0x32   :  { %236 = vmatpush.msrb.mxu0 %v91_v30  ;;  %255 = vmatpush.msrb.mxu1 %v108_v31  ;;  %v122_v36 = vld [vmem:[%s834_s1 + $0x330] sm:$0xff]  ;;  %v139_v37 = vld [vmem:[%s834_s1 + $0x3b8] sm:$0xff]  ;;  %v121_v40 = vld [vmem:[%s834_s1 + $0x328] sm:$0xff] }
  0x33   :  { %276 = vmatpush.msrb.mxu2 %v123_v32  ;;  %295 = vmatpush.msrb.mxu3 %v140_v33  ;;  %v106_v39 = vld [vmem:[%s834_s1 + $0x2b0] sm:$0xff]  ;;  %v88_v43 = vld [vmem:[%s834_s1 + $0x220] sm:$0xff]  ;;  %v105_v44 = vld [vmem:[%s834_s1 + $0x2a8] sm:$0xff]  ;;  %v404_v33 = vmov -1.0  }
  0x34   :  { %237 = vmatpush.msrb.mxu0 %v90_v34  ;;  %256 = vmatpush.msrb.mxu1 %v107_v35  ;;  %v138_v41 = vld [vmem:[%s834_s1 + $0x3b0] sm:$0xff]  ;;  %v120_v45 = vld [vmem:[%s834_s1 + $0x320] sm:$0xff]  ;;  %v137_v46 = vld [vmem:[%s834_s1 + $0x3a8] sm:$0xff] }
  0x35   :  { %277 = vmatpush.msrb.mxu2 %v122_v36  ;;  %296 = vmatpush.msrb.mxu3 %v139_v37  ;;  %v14_v42 = vld [vmem:[%s833_s0 + $0x10] sm:$0xff]  ;;  %v12_v47 = vld [vmem:[%s833_s0] sm:$0xff]  ;;  %v15_v48 = vld [vmem:[%s833_s0 + $0x18] sm:$0xff] }
  0x36   :  { %238 = vmatpush.msrb.mxu0 %v89_v38  ;;  %257 = vmatpush.msrb.mxu1 %v106_v39  ;;  %v87_v49 = vld [vmem:[%s834_s1 + $0x218] sm:$0xff]  ;;  %v104_v50 = vld [vmem:[%s834_s1 + $0x2a0] sm:$0xff]  ;;  %v13_v53 = vld [vmem:[%s833_s0 + $0x8] sm:$0xff] }
  0x37   :  { %278 = vmatpush.msrb.mxu2 %v121_v40  ;;  %297 = vmatpush.msrb.mxu3 %v138_v41  ;;  %v119_v51 = vld [vmem:[%s834_s1 + $0x318] sm:$0xff]  ;;  %v136_v52 = vld [vmem:[%s834_s1 + $0x3a0] sm:$0xff]  ;;  %v86_v54 = vld [vmem:[%s834_s1 + $0x210] sm:$0xff] }
  0x38   :  { %204 = vmatmul.f32.vlgmr.msra.gmra.mxu2 %v14_v42  ;;  %239 = vmatpush.msrb.mxu0 %v88_v43  ;;  %v103_v55 = vld [vmem:[%s834_s1 + $0x298] sm:$0xff]  ;;  %v118_v56 = vld [vmem:[%s834_s1 + $0x310] sm:$0xff]  ;;  %v85_v58 = vld [vmem:[%s834_s1 + $0x208] sm:$0xff] }
  0x39   :  { %258 = vmatpush.msrb.mxu1 %v105_v44  ;;  %279 = vmatpush.msrb.mxu2 %v120_v45  ;;  %v135_v57 = vld [vmem:[%s834_s1 + $0x398] sm:$0xff]  ;;  %v102_v59 = vld [vmem:[%s834_s1 + $0x290] sm:$0xff]  ;;  %v117_v60 = vld [vmem:[%s834_s1 + $0x308] sm:$0xff] }
  0x3a   :  { %298 = vmatpush.msrb.mxu3 %v137_v46  ;;  %164 = vmatmul.f32.vlgmr.msra.gmra.mxu0 %v12_v47  ;;  %v134_v61 = vld [vmem:[%s834_s1 + $0x390] sm:$0xff]  ;;  %v84_v62 = vld [vmem:[%s834_s1 + $0x200] sm:$0xff]  ;;  %v101_v63 = vld [vmem:[%s834_s1 + $0x288] sm:$0xff] }
  0x3b   :  { %224 = vmatmul.f32.vlgmr.msra.gmra.mxu3 %v15_v48  ;;  %240 = vmatpush.msrb.mxu0 %v87_v49  ;;  %v116_v0 = vld [vmem:[%s834_s1 + $0x300] sm:$0xff]  ;;  %v133_v1 = vld [vmem:[%s834_s1 + $0x388] sm:$0xff]  ;;  %v18_v3 = vld [vmem:[%s833_s0 + $0x30] sm:$0xff] }
  0x3c   :  { %259 = vmatpush.msrb.mxu1 %v104_v50  ;;  %280 = vmatpush.msrb.mxu2 %v119_v51  ;;  %v16_v2 = vld [vmem:[%s833_s0 + $0x20] sm:$0xff]  ;;  %v17_v6 = vld [vmem:[%s833_s0 + $0x28] sm:$0xff]  ;;  %v19_v7 = vld [vmem:[%s833_s0 + $0x38] sm:$0xff]  ;;  %s405_s0 = smov 32  }
  0x3d   :  { %299 = vmatpush.msrb.mxu3 %v136_v52  ;;  %184 = vmatmul.f32.vlgmr.msra.gmra.mxu1 %v13_v53  ;;  %v100_v4 = vld [vmem:[%s834_s1 + $0x280] sm:$0xff] }
  0x3e   :  { %241 = vmatpush.msrb.mxu0 %v86_v54  ;;  %260 = vmatpush.msrb.mxu1 %v103_v55  ;;  %v132_v5 = vld [vmem:[%s834_s1 + $0x380] sm:$0xff]  ;;  %s406_s1 = smov [#allocation2]  }
  0x3f   :  { %281 = vmatpush.msrb.mxu2 %v118_v56  ;;  %300 = vmatpush.msrb.mxu3 %v135_v57  ;;  %s362_s29 = sshll.u32 %s406_s1, 4  ;;  %s363_s29 = int_to_ptr.vmem [resolvable:$true] %s362_s29 }
  0x40   :  { %242 = vmatpush.msrb.mxu0 %v85_v58  ;;  %261 = vmatpush.msrb.mxu1 %v102_v59 }
  0x41   :  { %282 = vmatpush.msrb.mxu2 %v117_v60  ;;  %301 = vmatpush.msrb.mxu3 %v134_v61 }
  0x42   :  { %243 = vmatpush.msrb.mxu0 %v84_v62  ;;  %262 = vmatpush.msrb.mxu1 %v101_v63 }
  0x43   :  { %283 = vmatpush.msrb.mxu2 %v116_v0  ;;  %302 = vmatpush.msrb.mxu3 %v133_v1 }
  0x44   :  { %244 = vmatmul.f32.vlgmr.msrb.gmra.mxu0 %v16_v2  ;;  %284 = vmatmul.f32.vlgmr.msrb.gmra.mxu2 %v18_v3 }
  0x45   :  { %263 = vmatpush.msrb.mxu1 %v100_v4  ;;  %303 = vmatpush.msrb.mxu3 %v132_v5 }
  0x46   :  { %264 = vmatmul.f32.vlgmr.msrb.gmra.mxu1 %v17_v6  ;;  %304 = vmatmul.f32.vlgmr.msrb.gmra.mxu3 %v19_v7 }
  0xb7   :  { %v165_v8 = vpop.f32.mrf.mxu0 }
  0xba   :  { %v185_v9 = vpop.f32.mrf.mxu1 }
  0xbb   :  { %v186_v10 = vadd.f32 %v185_v9, %v165_v8  ;;  %v205_v11 = vpop.f32.mrf.mxu2 }
  0xbd   :  { %v206_v12 = vadd.f32 %v205_v11, %v186_v10 }
  0xbe   :  { %v225_v13 = vpop.f32.mrf.mxu3 }
  0xbf   :  { %v226_v14 = vadd.f32 %v225_v13, %v206_v12 }
  0xc1   :  { %v245_v15 = vpop.f32.mrf.mxu0 }
  0xc2   :  { %v246_v16 = vadd.f32 %v245_v15, %v226_v14 }
  0xc3   :  { %v265_v17 = vpop.f32.mrf.mxu1 }
  0xc4   :  { %v266_v18 = vadd.f32 %v265_v17, %v246_v16 }
  0xc7   :  { %v285_v19 = vpop.f32.mrf.mxu2 }
  0xc8   :  { %v286_v20 = vadd.f32 %v285_v19, %v266_v18 }
  0xc9   :  { %v305_v21 = vpop.f32.mrf.mxu3 }
  0xca   :  { %v306_v22 = vadd.f32 %v305_v21, %v286_v20 }
  0xcc   :  { %v308_v23 = vmul.f32 0.63661975, %v306_v22 }
  0xce   :  { %v309_v24 = vadd.f32 0.5, %v308_v23 }
  0xd0   :  { %v310_v25 = vfloor.f32 %v309_v24 }
  0xd2   :  { %v312_v26 = vmul.f32 1.5703125, %v310_v25  ;;  %v374_v27 = vcvt.f32.s32 %v310_v25  ;;  %v314_v29 = vmul.f32 0.0004837513, %v310_v25  ;;  %v316_v32 = vmul.f32 7.54979e-08, %v310_v25 }
  0xd4   :  { %v313_v28 = vsub.f32 %v306_v22, %v312_v26  ;;  %v337_v30 = vand.u32 2, %v374_v27  ;;  %v340_v40 = vadd.s32 1, %v374_v27  ;;  %v335_v51 = vand.u32 1, %v374_v27 }
  0xd6   :  { %v315_v31 = vsub.f32 %v313_v28, %v314_v29  ;;  %vm338_vm0 = vcmp.eq.s32.totalorder %v337_v30, 0  ;;  %v341_v47 = vand.u32 2, %v340_v40  ;;  %vm336_vm2 = vcmp.eq.s32.totalorder %v335_v51, 1 }
  0xd7   :  { %v339_v34 = vsel %vm338_vm0, 1.0, %v404_v33 }
  0xd8   :  { %v317_v35 = vsub.f32 %v315_v31, %v316_v32  ;;  %vm342_vm1 = vcmp.eq.s32.totalorder %v341_v47, 0 }
  0xd9   :  { %v343_v56 = vsel %vm342_vm1, 1.0, %v404_v33 }
  0xda   :  { %v318_v36 = vmul.f32 %v317_v35, %v317_v35 }
  0xdc   :  { %v320_v37 = vmul.f32 -0.00019515296, %v318_v36  ;;  %v329_v38 = vmul.f32 2.4433157e-05, %v318_v36  ;;  %v326_v43 = vmul.f32 0.5, %v318_v36  ;;  %v319_v45 = vmul.f32 %v318_v36, %v317_v35 }
  0xdd   :  { %v328_v48 = vmul.f32 %v318_v36, %v318_v36 }
  0xde   :  { %v321_v39 = vadd.f32 0.008332161, %v320_v37  ;;  %v330_v41 = vadd.f32 -0.0013887316, %v329_v38  ;;  %v327_v52 = vsub.f32 1.0, %v326_v43 }
  0xe0   :  { %v322_v42 = vmul.f32 %v321_v39, %v318_v36  ;;  %v331_v44 = vmul.f32 %v330_v41, %v318_v36 }
  0xe2   :  { %v323_v46 = vadd.f32 -0.16666655, %v322_v42  ;;  %v332_v49 = vadd.f32 0.041666646, %v331_v44 }
  0xe4   :  { %v324_v50 = vmul.f32 %v323_v46, %v319_v45  ;;  %v333_v53 = vmul.f32 %v332_v49, %v328_v48 }
  0xe6   :  { %v325_v54 = vadd.f32 %v324_v50, %v317_v35  ;;  %v334_v55 = vadd.f32 %v333_v53, %v327_v52 }
  0xe8   :  { %v344_v57 = vsel %vm336_vm2, %v334_v55, %v325_v54  ;;  %v346_v58 = vsel %vm336_vm2, %v325_v54, %v334_v55 }
  0xe9   :  { %v345_v59 = vmul.f32 %v344_v57, %v339_v34  ;;  %v347_v60 = vmul.f32 %v346_v58, %v343_v56 }
  0xeb   :  { %349 = vrot.lane.b32.xlu0 %v347_v60, %s405_s0 }
 0x15d   :  { %v350_v61 = vpop.permute.xlu0 %349 }
 0x15e   :  { %v353_v62 = vsel %vm352_vm3, %v345_v59, %v350_v61 }
 0x15f   :  { %v354_v63 = vmul.f32 0.17677669, %v353_v62 }
 0x161   :  { %356 = vst.msk [vmem:[#allocation2] sm:$0xff] %vm355_vm4, %v354_v63 }
 0x162   :  { %367 = dma.vmem_to_hbm [thread:$0]  %s363_s29, 128, %s365_s4, [#allocation3]  }
 0x163   :  { %402 = dma.done.wait [#allocation3], 128  }
 0x164   :  { %403 = vsyncadd [#allocation3], 4294967168 }
 0x165   :  { %372 = vsyncpa [#allocation3], 1 }

</bundles_post_ra>
